<compile_context>
chip_gen: v5e
topology: v5e:2x2
jax: 0.10.0
libtpu: 0.0.40
codegen_flags: <defaults>
</compile_context>

<pallas_src>
import functools
import numpy as np
import jax
import jax.numpy as jnp
from jax.experimental import pallas as pl
from jax.experimental.pallas import tpu as pltpu

# ---- deterministic "registered buffer" init (mirrors SMPLifyLoss.__init__) ----
RHO = 100.0
DATA_WEIGHT = 1.0
BODY_POSE_WEIGHT = 0.5
SHAPE_WEIGHT = 0.3
BENDING_PRIOR_WEIGHT = 0.2
USE_JOINTS_CONF = True
USE_3D = True

# SMPLify angle (bending) prior: indices into full_pose[:, 3:66], with signs
ANGLE_IDXS = (52, 55, 9, 12)
ANGLE_SIGNS = (1.0, -1.0, -1.0, -1.0)

N_POSE = 63  # body_pose = full_pose[:, 3:66]


def _round_up(x, m):
    return ((x + m - 1) // m) * m


def _make_kernel(n_cams, n_valid):
    """Kernel factory; n_cams / n_valid (=B*J) are baked in as static Python ints.

    All loss weights are Python floats so they lower as literals (no captured consts).
    """
    dw2 = float(DATA_WEIGHT * DATA_WEIGHT)
    w_pe = float(BODY_POSE_WEIGHT * BODY_POSE_WEIGHT)
    w_sh = float(SHAPE_WEIGHT * SHAPE_WEIGHT)
    w_bend = float(BENDING_PRIOR_WEIGHT)
    rho2 = float(RHO * RHO)

    def recip(x):
        # EUP approx reciprocal + one Newton-Raphson step (VALU slack is huge here).
        inv = pl.reciprocal(x, approx=True)
        return inv * (2.0 - x * inv)

    def gmof(x):
        # robustifier: rho^2 * x^2 / (x^2 + rho^2)
        x2 = x * x
        return (rho2 * x2) * recip(x2 + rho2)

    def kernel(cam_ref,    # SMEM (n_cams*16,)  per-cam [R(9), t(3), f(2), center(2)]
               dyn_ref,    # VMEM (8, L)        [jx, jy, jz, pose_emb, betas, body_pose, 0, 0]
               const_ref,  # VMEM (RC, L)       [g3x,g3y,g3z,conf3d,jw,sel,msk, gt2d uv rows, conf2d rows]
               out_ref):   # SMEM (1, 1)
        D = dyn_ref[...]
        K = const_ref[...]
        jx, jy, jz = D[0:1], D[1:2], D[2:3]
        pe, be, bp = D[3:4], D[4:5], D[5:6]
        g3x, g3y, g3z = K[0:1], K[1:2], K[2:3]
        c3 = K[3:4]
        jw = K[4:5]
        sel = K[5:6]
        msk = K[6:7]

        L = D.shape[1]
        lane = jax.lax.broadcasted_iota(jnp.int32, (1, L), 1)
        valid = lane < n_valid   # padded lanes carry zero weights; only 1/pz needs guarding

        # single per-lane accumulator: 3D term + reprojection terms of all cameras
        if USE_3D:
            acc = c3 * c3 * (gmof(g3x - jx) + gmof(g3y - jy) + gmof(g3z - jz))
        else:
            acc = jnp.zeros_like(jx)

        # Static unroll over cameras (C is tiny).  For C >~ 8 switch to
        # lax.fori_loop(..., unroll=True) with dynamic SMEM offsets.
        for c in range(n_cams):
            base = c * 16
            r00 = cam_ref[base + 0]; r01 = cam_ref[base + 1]; r02 = cam_ref[base + 2]
            r10 = cam_ref[base + 3]; r11 = cam_ref[base + 4]; r12 = cam_ref[base + 5]
            r20 = cam_ref[base + 6]; r21 = cam_ref[base + 7]; r22 = cam_ref[base + 8]
            tx = cam_ref[base + 9]; ty = cam_ref[base + 10]; tz = cam_ref[base + 11]
            fx = cam_ref[base + 12]; fy = cam_ref[base + 13]
            cx = cam_ref[base + 14]; cy = cam_ref[base + 15]

            # rigid transform + perspective projection (scalar-broadcast FMAs on VPU;
            # deliberately NOT jnp.dot -- K=3 would waste the MXU)
            px = jx * r00 + jy * r01 + jz * r02 + tx
            py = jx * r10 + jy * r11 + jz * r12 + ty
            pz = jx * r20 + jy * r21 + jz * r22 + tz
            pz = jnp.where(valid, pz, 1.0)        # keep padded lanes finite
            inv_pz = recip(pz)
            u = fx * px * inv_pz + cx
            v = fy * py * inv_pz + cy

            du = K[7 + 2 * c: 8 + 2 * c] - u
            dv = K[8 + 2 * c: 9 + 2 * c] - v
            if USE_JOINTS_CONF:
                w = jw * K[7 + 2 * n_cams + c: 8 + 2 * n_cams + c]
            else:
                w = jw
            acc = acc + (w * w) * (gmof(du) + gmof(dv))

        data_total = jnp.sum(acc) * dw2           # one fused reduction for 2D+3D terms

        e = jnp.exp(bp * sel)
        prior_total = jnp.sum(w_pe * (pe * pe) + w_sh * (be * be) + w_bend * (msk * e * e))

        out_ref[0, 0] = data_total + prior_total

    return kernel


@functools.lru_cache(maxsize=8)
def _angle_rows(batch, n_pose):
    """Cached constant (1, B*n_pose) sign/mask rows for the bending prior (numpy)."""
    sel = np.zeros((n_pose,), dtype=np.float32)
    msk = np.zeros((n_pose,), dtype=np.float32)
    for i, s in zip(ANGLE_IDXS, ANGLE_SIGNS):
        sel[i] = s
        msk[i] = 1.0
    sel_b = np.tile(sel, batch).reshape(1, batch * n_pose)
    msk_b = np.tile(msk, batch).reshape(1, batch * n_pose)
    return sel_b, msk_b


def prepare_problem(cams, gt_joints, joints_conf, joint_weights,
                    gt_joints3d, joints3d_conf, n_pose_embed, n_betas):
    """Pack everything that is constant across optimizer steps, ONCE, host-side.

    Returns (cam_params (C*16,) f32 device array, const_slab (RC, L) f32 device array).
    """
    C = len(cams)
    gt3d = np.asarray(gt_joints3d, np.float32)
    B, J, _ = gt3d.shape
    BJ = B * J
    L = _round_up(max(BJ, B * N_POSE, B * n_pose_embed, B * n_betas), 128)

    # camera table: per camera [R(9 row-major), t(3), f(2), center(2)]
    flat = []
    for (R, t, f, c) in cams:
        flat.append(np.concatenate([np.asarray(R, np.float32).reshape(-1),
                                    np.asarray(t, np.float32).reshape(-1),
                                    np.asarray(f, np.float32).reshape(-1),
                                    np.asarray(c, np.float32).reshape(-1)]))
    cam_params = np.concatenate(flat).astype(np.float32)

    def padw(x):
        x = np.asarray(x, np.float32)
        return np.pad(x, ((0, 0), (0, L - x.shape[1])))

    sel, msk = _angle_rows(B, N_POSE)
    rows = [
        padw(np.transpose(gt3d, (2, 0, 1)).reshape(3, BJ)),          # rows 0-2: gt3d xyz
        padw(np.asarray(joints3d_conf, np.float32).reshape(1, BJ)),  # row 3: conf3d
        padw(np.asarray(joint_weights, np.float32).reshape(1, BJ)),  # row 4: joint_weights
        padw(sel),                                                   # row 5: angle sign
        padw(msk),                                                   # row 6: angle mask
    ]
    for c in range(C):                                               # rows 7+2c, 8+2c: gt2d u/v
        g = np.asarray(gt_joints[c], np.float32)
        rows.append(padw(np.transpose(g, (2, 0, 1)).reshape(2, BJ)))
    for c in range(C):                                               # rows 7+2C+c: conf2d
        rows.append(padw(np.asarray(joints_conf[c], np.float32).reshape(1, BJ)))

    const = np.concatenate(rows, axis=0)
    RC = _round_up(const.shape[0], 8)
    const = np.pad(const, ((0, RC - const.shape[0]), (0, 0)))
    return jnp.asarray(cam_params), jnp.asarray(const)


@jax.jit
def smplify_loss(cam_params, const_slab, joints, pose_embedding, betas, full_pose):
    """Per-step loss.  Only the dynamic quantities are packed here (fused under jit)."""
    C = cam_params.shape[0] // 16
    B, J, _ = joints.shape
    BJ = B * J
    L = const_slab.shape[1]

    def padw(x):
        x = x.astype(jnp.float32)
        return jnp.pad(x, ((0, 0), (0, L - x.shape[1])))

    j_rows = jnp.transpose(joints, (2, 0, 1)).reshape(3, BJ)
    dyn = jnp.concatenate(
        [padw(j_rows),
         padw(pose_embedding.reshape(1, -1)),
         padw(betas.reshape(1, -1)),
         padw(full_pose[:, 3:66].reshape(1, -1)),
         jnp.zeros((2, L), jnp.float32)], axis=0)          # (8, L)

    kernel = _make_kernel(C, BJ)
    vmem = pl.BlockSpec(memory_space=pltpu.MemorySpace.VMEM)
    smem = pl.BlockSpec(memory_space=pltpu.MemorySpace.SMEM)

    out = pl.pallas_call(
        kernel,
        out_shape=jax.ShapeDtypeStruct((1, 1), jnp.float32),
        in_specs=[smem, vmem, vmem],
        out_specs=smem,
    )(cam_params, dyn, const_slab)
    return out[0, 0]


def smplify_loss_ref(cams, gt_joints, joints_conf, joints, joint_weights,
                     gt_joints3d, joints3d_conf, pose_embedding, betas, full_pose):
    """Pure-JAX reference mirroring the PyTorch forward (same config)."""
    rho2 = RHO ** 2
    gmof = lambda x: rho2 * x ** 2 / (x ** 2 + rho2)
    joint_loss = 0.0
    for c, (R, t, f, ctr) in enumerate(cams):
        pc = joints @ jnp.asarray(R, jnp.float32).T + jnp.asarray(t, jnp.float32)
        uv = jnp.asarray(f, jnp.float32) * pc[..., :2] / pc[..., 2:3] + jnp.asarray(ctr, jnp.float32)
        w = (joint_weights * joints_conf[c])[..., None]
        joint_loss += jnp.sum(w ** 2 * gmof(gt_joints[c] - uv))
    joint_loss = joint_loss * DATA_WEIGHT ** 2
    joints3d_loss = jnp.sum(joints3d_conf[..., None] ** 2 * gmof(gt_joints3d - joints)) * DATA_WEIGHT ** 2
    pprior_loss = jnp.sum(pose_embedding ** 2) * BODY_POSE_WEIGHT ** 2
    shape_loss = jnp.sum(betas ** 2) * SHAPE_WEIGHT ** 2
    bp = full_pose[:, 3:66]
    idxs = np.asarray(ANGLE_IDXS)
    signs = jnp.asarray(ANGLE_SIGNS, jnp.float32)
    angle_loss = jnp.sum(jnp.exp(bp[:, idxs] * signs) ** 2) * BENDING_PRIOR_WEIGHT
    return joint_loss + joints3d_loss + pprior_loss + shape_loss + angle_loss


if __name__ == "__main__":
    key = jax.random.PRNGKey(0)
    B, J, C, E, NB = 2, 24, 2, 32, 10
    ks = jax.random.split(key, 10)

    joints = 0.3 * jax.random.normal(ks[0], (B, J, 3), jnp.float32)

    def rot_y(a):
        ca, sa = np.cos(a), np.sin(a)
        return np.array([[ca, 0.0, sa], [0.0, 1.0, 0.0], [-sa, 0.0, ca]], np.float32)

    cams = []
    for ci in range(C):
        cams.append((rot_y(0.1 * ci),
                     np.array([0.05 * ci, 0.0, 5.0], np.float32),
                     np.array([500.0, 500.0], np.float32),
                     np.array([128.0, 128.0], np.float32)))

    gt_joints = [128.0 + 30.0 * jax.random.normal(ks[1 + ci], (B, J, 2), jnp.float32)
                 for ci in range(C)]
    joints_conf = [jax.random.uniform(ks[3 + ci], (B, J), jnp.float32) for ci in range(C)]
    joint_weights = jnp.ones((B, J), jnp.float32)
    gt_joints3d = joints + 0.05 * jax.random.normal(ks[5], (B, J, 3), jnp.float32)
    joints3d_conf = jax.random.uniform(ks[6], (B, J), jnp.float32)
    pose_embedding = 0.1 * jax.random.normal(ks[7], (B, E), jnp.float32)
    betas = 0.5 * jax.random.normal(ks[8], (B, NB), jnp.float32)
    full_pose = 0.2 * jax.random.normal(ks[9], (B, 72), jnp.float32)

    # Pack per-problem constants ONCE (camera table, gt2d/conf2d, gt3d/conf3d,
    # joint_weights, angle sel/mask); only joints / pose / betas change per step.
    cam_params, const_slab = prepare_problem(
        cams, gt_joints, joints_conf, joint_weights,
        gt_joints3d, joints3d_conf, n_pose_embed=E, n_betas=NB)

    total = smplify_loss(cam_params, const_slab, joints, pose_embedding, betas, full_pose)
    total = jax.block_until_ready(total)

    ref = smplify_loss_ref(cams, gt_joints, joints_conf, joints, joint_weights,
                           gt_joints3d, joints3d_conf, pose_embedding, betas, full_pose)
    ref = jax.block_until_ready(ref)

    assert np.isfinite(float(total))
    # approx reciprocal + one NR step -> near-exact; tight tolerance restored.
    np.testing.assert_allclose(float(total), float(ref), rtol=1e-4, atol=1e-2)
    print("KERNEL_OK")
</pallas_src>

<mosaic_0001>
module attributes {stable_mosaic.version = 11 : i64} {
  func.func @kernel(%arg0: memref<32xf32, #tpu.memory_space<smem>>, %arg1: memref<8x128xf32, #tpu.memory_space<vmem>>, %arg2: memref<16x128xf32, #tpu.memory_space<vmem>>, %arg3: memref<1x1xf32, #tpu.memory_space<smem>>) attributes {dimension_semantics = [], scalar_prefetch = 0 : i64, scratch_operands = 0 : i64, tpu.core_type = #tpu.core_type<tc>} {
    %c0 = arith.constant 0 : index
    %c0_0 = arith.constant 0 : index
    %0 = vector.load %arg1[%c0, %c0_0] : memref<8x128xf32, #tpu.memory_space<vmem>>, vector<8x128xf32>
    %c0_1 = arith.constant 0 : index
    %c0_2 = arith.constant 0 : index
    %1 = vector.load %arg2[%c0_1, %c0_2] : memref<16x128xf32, #tpu.memory_space<vmem>>, vector<16x128xf32>
    %2 = vector.extract_strided_slice %0 {offsets = [0, 0], sizes = [1, 128], strides = [1, 1]} : vector<8x128xf32> to vector<1x128xf32>
    %3 = vector.extract_strided_slice %0 {offsets = [1, 0], sizes = [1, 128], strides = [1, 1]} : vector<8x128xf32> to vector<1x128xf32>
    %4 = vector.extract_strided_slice %0 {offsets = [2, 0], sizes = [1, 128], strides = [1, 1]} : vector<8x128xf32> to vector<1x128xf32>
    %5 = vector.extract_strided_slice %0 {offsets = [3, 0], sizes = [1, 128], strides = [1, 1]} : vector<8x128xf32> to vector<1x128xf32>
    %6 = vector.extract_strided_slice %0 {offsets = [4, 0], sizes = [1, 128], strides = [1, 1]} : vector<8x128xf32> to vector<1x128xf32>
    %7 = vector.extract_strided_slice %0 {offsets = [5, 0], sizes = [1, 128], strides = [1, 1]} : vector<8x128xf32> to vector<1x128xf32>
    %8 = vector.extract_strided_slice %1 {offsets = [0, 0], sizes = [1, 128], strides = [1, 1]} : vector<16x128xf32> to vector<1x128xf32>
    %9 = vector.extract_strided_slice %1 {offsets = [1, 0], sizes = [1, 128], strides = [1, 1]} : vector<16x128xf32> to vector<1x128xf32>
    %10 = vector.extract_strided_slice %1 {offsets = [2, 0], sizes = [1, 128], strides = [1, 1]} : vector<16x128xf32> to vector<1x128xf32>
    %11 = vector.extract_strided_slice %1 {offsets = [3, 0], sizes = [1, 128], strides = [1, 1]} : vector<16x128xf32> to vector<1x128xf32>
    %12 = vector.extract_strided_slice %1 {offsets = [4, 0], sizes = [1, 128], strides = [1, 1]} : vector<16x128xf32> to vector<1x128xf32>
    %13 = vector.extract_strided_slice %1 {offsets = [5, 0], sizes = [1, 128], strides = [1, 1]} : vector<16x128xf32> to vector<1x128xf32>
    %14 = vector.extract_strided_slice %1 {offsets = [6, 0], sizes = [1, 128], strides = [1, 1]} : vector<16x128xf32> to vector<1x128xf32>
    %15 = tpu.iota {dimensions = array<i32: 1>} : vector<1x128xi32>
    %c48_i32 = arith.constant 48 : i32
    %16 = vector.broadcast %c48_i32 : i32 to vector<1x128xi32>
    %17 = arith.cmpi slt, %15, %16 : vector<1x128xi32>
    %18 = arith.mulf %11, %11 : vector<1x128xf32>
    %19 = arith.subf %8, %2 : vector<1x128xf32>
    %20 = arith.mulf %19, %19 : vector<1x128xf32>
    %cst = arith.constant 1.000000e+04 : f32
    %21 = vector.broadcast %cst : f32 to vector<1x128xf32>
    %22 = arith.mulf %21, %20 : vector<1x128xf32>
    %cst_3 = arith.constant 1.000000e+04 : f32
    %23 = vector.broadcast %cst_3 : f32 to vector<1x128xf32>
    %24 = arith.addf %20, %23 : vector<1x128xf32>
    %25 = tpu.reciprocal %24 {approx = true} : vector<1x128xf32> -> vector<1x128xf32>
    %26 = arith.mulf %24, %25 : vector<1x128xf32>
    %cst_4 = arith.constant 2.000000e+00 : f32
    %27 = vector.broadcast %cst_4 : f32 to vector<1x128xf32>
    %28 = arith.subf %27, %26 : vector<1x128xf32>
    %29 = arith.mulf %25, %28 : vector<1x128xf32>
    %30 = arith.mulf %22, %29 : vector<1x128xf32>
    %31 = arith.subf %9, %3 : vector<1x128xf32>
    %32 = arith.mulf %31, %31 : vector<1x128xf32>
    %cst_5 = arith.constant 1.000000e+04 : f32
    %33 = vector.broadcast %cst_5 : f32 to vector<1x128xf32>
    %34 = arith.mulf %33, %32 : vector<1x128xf32>
    %cst_6 = arith.constant 1.000000e+04 : f32
    %35 = vector.broadcast %cst_6 : f32 to vector<1x128xf32>
    %36 = arith.addf %32, %35 : vector<1x128xf32>
    %37 = tpu.reciprocal %36 {approx = true} : vector<1x128xf32> -> vector<1x128xf32>
    %38 = arith.mulf %36, %37 : vector<1x128xf32>
    %cst_7 = arith.constant 2.000000e+00 : f32
    %39 = vector.broadcast %cst_7 : f32 to vector<1x128xf32>
    %40 = arith.subf %39, %38 : vector<1x128xf32>
    %41 = arith.mulf %37, %40 : vector<1x128xf32>
    %42 = arith.mulf %34, %41 : vector<1x128xf32>
    %43 = arith.addf %30, %42 : vector<1x128xf32>
    %44 = arith.subf %10, %4 : vector<1x128xf32>
    %45 = arith.mulf %44, %44 : vector<1x128xf32>
    %cst_8 = arith.constant 1.000000e+04 : f32
    %46 = vector.broadcast %cst_8 : f32 to vector<1x128xf32>
    %47 = arith.mulf %46, %45 : vector<1x128xf32>
    %cst_9 = arith.constant 1.000000e+04 : f32
    %48 = vector.broadcast %cst_9 : f32 to vector<1x128xf32>
    %49 = arith.addf %45, %48 : vector<1x128xf32>
    %50 = tpu.reciprocal %49 {approx = true} : vector<1x128xf32> -> vector<1x128xf32>
    %51 = arith.mulf %49, %50 : vector<1x128xf32>
    %cst_10 = arith.constant 2.000000e+00 : f32
    %52 = vector.broadcast %cst_10 : f32 to vector<1x128xf32>
    %53 = arith.subf %52, %51 : vector<1x128xf32>
    %54 = arith.mulf %50, %53 : vector<1x128xf32>
    %55 = arith.mulf %47, %54 : vector<1x128xf32>
    %56 = arith.addf %43, %55 : vector<1x128xf32>
    %57 = arith.mulf %18, %56 : vector<1x128xf32>
    %c0_11 = arith.constant 0 : index
    %58 = memref.load %arg0[%c0_11] : memref<32xf32, #tpu.memory_space<smem>>
    %c1 = arith.constant 1 : index
    %59 = memref.load %arg0[%c1] : memref<32xf32, #tpu.memory_space<smem>>
    %c2 = arith.constant 2 : index
    %60 = memref.load %arg0[%c2] : memref<32xf32, #tpu.memory_space<smem>>
    %c3 = arith.constant 3 : index
    %61 = memref.load %arg0[%c3] : memref<32xf32, #tpu.memory_space<smem>>
    %c4 = arith.constant 4 : index
    %62 = memref.load %arg0[%c4] : memref<32xf32, #tpu.memory_space<smem>>
    %c5 = arith.constant 5 : index
    %63 = memref.load %arg0[%c5] : memref<32xf32, #tpu.memory_space<smem>>
    %c6 = arith.constant 6 : index
    %64 = memref.load %arg0[%c6] : memref<32xf32, #tpu.memory_space<smem>>
    %c7 = arith.constant 7 : index
    %65 = memref.load %arg0[%c7] : memref<32xf32, #tpu.memory_space<smem>>
    %c8 = arith.constant 8 : index
    %66 = memref.load %arg0[%c8] : memref<32xf32, #tpu.memory_space<smem>>
    %c9 = arith.constant 9 : index
    %67 = memref.load %arg0[%c9] : memref<32xf32, #tpu.memory_space<smem>>
    %c10 = arith.constant 10 : index
    %68 = memref.load %arg0[%c10] : memref<32xf32, #tpu.memory_space<smem>>
    %c11 = arith.constant 11 : index
    %69 = memref.load %arg0[%c11] : memref<32xf32, #tpu.memory_space<smem>>
    %c12 = arith.constant 12 : index
    %70 = memref.load %arg0[%c12] : memref<32xf32, #tpu.memory_space<smem>>
    %c13 = arith.constant 13 : index
    %71 = memref.load %arg0[%c13] : memref<32xf32, #tpu.memory_space<smem>>
    %c14 = arith.constant 14 : index
    %72 = memref.load %arg0[%c14] : memref<32xf32, #tpu.memory_space<smem>>
    %c15 = arith.constant 15 : index
    %73 = memref.load %arg0[%c15] : memref<32xf32, #tpu.memory_space<smem>>
    %74 = vector.broadcast %58 : f32 to vector<1x128xf32>
    %75 = arith.mulf %2, %74 : vector<1x128xf32>
    %76 = vector.broadcast %59 : f32 to vector<1x128xf32>
    %77 = arith.mulf %3, %76 : vector<1x128xf32>
    %78 = arith.addf %75, %77 : vector<1x128xf32>
    %79 = vector.broadcast %60 : f32 to vector<1x128xf32>
    %80 = arith.mulf %4, %79 : vector<1x128xf32>
    %81 = arith.addf %78, %80 : vector<1x128xf32>
    %82 = vector.broadcast %67 : f32 to vector<1x128xf32>
    %83 = arith.addf %81, %82 : vector<1x128xf32>
    %84 = vector.broadcast %61 : f32 to vector<1x128xf32>
    %85 = arith.mulf %2, %84 : vector<1x128xf32>
    %86 = vector.broadcast %62 : f32 to vector<1x128xf32>
    %87 = arith.mulf %3, %86 : vector<1x128xf32>
    %88 = arith.addf %85, %87 : vector<1x128xf32>
    %89 = vector.broadcast %63 : f32 to vector<1x128xf32>
    %90 = arith.mulf %4, %89 : vector<1x128xf32>
    %91 = arith.addf %88, %90 : vector<1x128xf32>
    %92 = vector.broadcast %68 : f32 to vector<1x128xf32>
    %93 = arith.addf %91, %92 : vector<1x128xf32>
    %94 = vector.broadcast %64 : f32 to vector<1x128xf32>
    %95 = arith.mulf %2, %94 : vector<1x128xf32>
    %96 = vector.broadcast %65 : f32 to vector<1x128xf32>
    %97 = arith.mulf %3, %96 : vector<1x128xf32>
    %98 = arith.addf %95, %97 : vector<1x128xf32>
    %99 = vector.broadcast %66 : f32 to vector<1x128xf32>
    %100 = arith.mulf %4, %99 : vector<1x128xf32>
    %101 = arith.addf %98, %100 : vector<1x128xf32>
    %102 = vector.broadcast %69 : f32 to vector<1x128xf32>
    %103 = arith.addf %101, %102 : vector<1x128xf32>
    %cst_12 = arith.constant 1.000000e+00 : f32
    %104 = vector.broadcast %cst_12 : f32 to vector<1x128xf32>
    %105 = arith.select %17, %103, %104 : vector<1x128xi1>, vector<1x128xf32>
    %106 = tpu.reciprocal %105 {approx = true} : vector<1x128xf32> -> vector<1x128xf32>
    %107 = arith.mulf %105, %106 : vector<1x128xf32>
    %cst_13 = arith.constant 2.000000e+00 : f32
    %108 = vector.broadcast %cst_13 : f32 to vector<1x128xf32>
    %109 = arith.subf %108, %107 : vector<1x128xf32>
    %110 = arith.mulf %106, %109 : vector<1x128xf32>
    %111 = vector.broadcast %70 : f32 to vector<1x128xf32>
    %112 = arith.mulf %111, %83 : vector<1x128xf32>
    %113 = arith.mulf %112, %110 : vector<1x128xf32>
    %114 = vector.broadcast %72 : f32 to vector<1x128xf32>
    %115 = arith.addf %113, %114 : vector<1x128xf32>
    %116 = vector.broadcast %71 : f32 to vector<1x128xf32>
    %117 = arith.mulf %116, %93 : vector<1x128xf32>
    %118 = arith.mulf %117, %110 : vector<1x128xf32>
    %119 = vector.broadcast %73 : f32 to vector<1x128xf32>
    %120 = arith.addf %118, %119 : vector<1x128xf32>
    %121 = vector.extract_strided_slice %1 {offsets = [7, 0], sizes = [1, 128], strides = [1, 1]} : vector<16x128xf32> to vector<1x128xf32>
    %122 = arith.subf %121, %115 : vector<1x128xf32>
    %123 = vector.extract_strided_slice %1 {offsets = [8, 0], sizes = [1, 128], strides = [1, 1]} : vector<16x128xf32> to vector<1x128xf32>
    %124 = arith.subf %123, %120 : vector<1x128xf32>
    %125 = vector.extract_strided_slice %1 {offsets = [11, 0], sizes = [1, 128], strides = [1, 1]} : vector<16x128xf32> to vector<1x128xf32>
    %126 = arith.mulf %12, %125 : vector<1x128xf32>
    %127 = arith.mulf %126, %126 : vector<1x128xf32>
    %128 = arith.mulf %122, %122 : vector<1x128xf32>
    %cst_14 = arith.constant 1.000000e+04 : f32
    %129 = vector.broadcast %cst_14 : f32 to vector<1x128xf32>
    %130 = arith.mulf %129, %128 : vector<1x128xf32>
    %cst_15 = arith.constant 1.000000e+04 : f32
    %131 = vector.broadcast %cst_15 : f32 to vector<1x128xf32>
    %132 = arith.addf %128, %131 : vector<1x128xf32>
    %133 = tpu.reciprocal %132 {approx = true} : vector<1x128xf32> -> vector<1x128xf32>
    %134 = arith.mulf %132, %133 : vector<1x128xf32>
    %cst_16 = arith.constant 2.000000e+00 : f32
    %135 = vector.broadcast %cst_16 : f32 to vector<1x128xf32>
    %136 = arith.subf %135, %134 : vector<1x128xf32>
    %137 = arith.mulf %133, %136 : vector<1x128xf32>
    %138 = arith.mulf %130, %137 : vector<1x128xf32>
    %139 = arith.mulf %124, %124 : vector<1x128xf32>
    %cst_17 = arith.constant 1.000000e+04 : f32
    %140 = vector.broadcast %cst_17 : f32 to vector<1x128xf32>
    %141 = arith.mulf %140, %139 : vector<1x128xf32>
    %cst_18 = arith.constant 1.000000e+04 : f32
    %142 = vector.broadcast %cst_18 : f32 to vector<1x128xf32>
    %143 = arith.addf %139, %142 : vector<1x128xf32>
    %144 = tpu.reciprocal %143 {approx = true} : vector<1x128xf32> -> vector<1x128xf32>
    %145 = arith.mulf %143, %144 : vector<1x128xf32>
    %cst_19 = arith.constant 2.000000e+00 : f32
    %146 = vector.broadcast %cst_19 : f32 to vector<1x128xf32>
    %147 = arith.subf %146, %145 : vector<1x128xf32>
    %148 = arith.mulf %144, %147 : vector<1x128xf32>
    %149 = arith.mulf %141, %148 : vector<1x128xf32>
    %150 = arith.addf %138, %149 : vector<1x128xf32>
    %151 = arith.mulf %127, %150 : vector<1x128xf32>
    %152 = arith.addf %57, %151 : vector<1x128xf32>
    %c16 = arith.constant 16 : index
    %153 = memref.load %arg0[%c16] : memref<32xf32, #tpu.memory_space<smem>>
    %c17 = arith.constant 17 : index
    %154 = memref.load %arg0[%c17] : memref<32xf32, #tpu.memory_space<smem>>
    %c18 = arith.constant 18 : index
    %155 = memref.load %arg0[%c18] : memref<32xf32, #tpu.memory_space<smem>>
    %c19 = arith.constant 19 : index
    %156 = memref.load %arg0[%c19] : memref<32xf32, #tpu.memory_space<smem>>
    %c20 = arith.constant 20 : index
    %157 = memref.load %arg0[%c20] : memref<32xf32, #tpu.memory_space<smem>>
    %c21 = arith.constant 21 : index
    %158 = memref.load %arg0[%c21] : memref<32xf32, #tpu.memory_space<smem>>
    %c22 = arith.constant 22 : index
    %159 = memref.load %arg0[%c22] : memref<32xf32, #tpu.memory_space<smem>>
    %c23 = arith.constant 23 : index
    %160 = memref.load %arg0[%c23] : memref<32xf32, #tpu.memory_space<smem>>
    %c24 = arith.constant 24 : index
    %161 = memref.load %arg0[%c24] : memref<32xf32, #tpu.memory_space<smem>>
    %c25 = arith.constant 25 : index
    %162 = memref.load %arg0[%c25] : memref<32xf32, #tpu.memory_space<smem>>
    %c26 = arith.constant 26 : index
    %163 = memref.load %arg0[%c26] : memref<32xf32, #tpu.memory_space<smem>>
    %c27 = arith.constant 27 : index
    %164 = memref.load %arg0[%c27] : memref<32xf32, #tpu.memory_space<smem>>
    %c28 = arith.constant 28 : index
    %165 = memref.load %arg0[%c28] : memref<32xf32, #tpu.memory_space<smem>>
    %c29 = arith.constant 29 : index
    %166 = memref.load %arg0[%c29] : memref<32xf32, #tpu.memory_space<smem>>
    %c30 = arith.constant 30 : index
    %167 = memref.load %arg0[%c30] : memref<32xf32, #tpu.memory_space<smem>>
    %c31 = arith.constant 31 : index
    %168 = memref.load %arg0[%c31] : memref<32xf32, #tpu.memory_space<smem>>
    %169 = vector.broadcast %153 : f32 to vector<1x128xf32>
    %170 = arith.mulf %2, %169 : vector<1x128xf32>
    %171 = vector.broadcast %154 : f32 to vector<1x128xf32>
    %172 = arith.mulf %3, %171 : vector<1x128xf32>
    %173 = arith.addf %170, %172 : vector<1x128xf32>
    %174 = vector.broadcast %155 : f32 to vector<1x128xf32>
    %175 = arith.mulf %4, %174 : vector<1x128xf32>
    %176 = arith.addf %173, %175 : vector<1x128xf32>
    %177 = vector.broadcast %162 : f32 to vector<1x128xf32>
    %178 = arith.addf %176, %177 : vector<1x128xf32>
    %179 = vector.broadcast %156 : f32 to vector<1x128xf32>
    %180 = arith.mulf %2, %179 : vector<1x128xf32>
    %181 = vector.broadcast %157 : f32 to vector<1x128xf32>
    %182 = arith.mulf %3, %181 : vector<1x128xf32>
    %183 = arith.addf %180, %182 : vector<1x128xf32>
    %184 = vector.broadcast %158 : f32 to vector<1x128xf32>
    %185 = arith.mulf %4, %184 : vector<1x128xf32>
    %186 = arith.addf %183, %185 : vector<1x128xf32>
    %187 = vector.broadcast %163 : f32 to vector<1x128xf32>
    %188 = arith.addf %186, %187 : vector<1x128xf32>
    %189 = vector.broadcast %159 : f32 to vector<1x128xf32>
    %190 = arith.mulf %2, %189 : vector<1x128xf32>
    %191 = vector.broadcast %160 : f32 to vector<1x128xf32>
    %192 = arith.mulf %3, %191 : vector<1x128xf32>
    %193 = arith.addf %190, %192 : vector<1x128xf32>
    %194 = vector.broadcast %161 : f32 to vector<1x128xf32>
    %195 = arith.mulf %4, %194 : vector<1x128xf32>
    %196 = arith.addf %193, %195 : vector<1x128xf32>
    %197 = vector.broadcast %164 : f32 to vector<1x128xf32>
    %198 = arith.addf %196, %197 : vector<1x128xf32>
    %cst_20 = arith.constant 1.000000e+00 : f32
    %199 = vector.broadcast %cst_20 : f32 to vector<1x128xf32>
    %200 = arith.select %17, %198, %199 : vector<1x128xi1>, vector<1x128xf32>
    %201 = tpu.reciprocal %200 {approx = true} : vector<1x128xf32> -> vector<1x128xf32>
    %202 = arith.mulf %200, %201 : vector<1x128xf32>
    %cst_21 = arith.constant 2.000000e+00 : f32
    %203 = vector.broadcast %cst_21 : f32 to vector<1x128xf32>
    %204 = arith.subf %203, %202 : vector<1x128xf32>
    %205 = arith.mulf %201, %204 : vector<1x128xf32>
    %206 = vector.broadcast %165 : f32 to vector<1x128xf32>
    %207 = arith.mulf %206, %178 : vector<1x128xf32>
    %208 = arith.mulf %207, %205 : vector<1x128xf32>
    %209 = vector.broadcast %167 : f32 to vector<1x128xf32>
    %210 = arith.addf %208, %209 : vector<1x128xf32>
    %211 = vector.broadcast %166 : f32 to vector<1x128xf32>
    %212 = arith.mulf %211, %188 : vector<1x128xf32>
    %213 = arith.mulf %212, %205 : vector<1x128xf32>
    %214 = vector.broadcast %168 : f32 to vector<1x128xf32>
    %215 = arith.addf %213, %214 : vector<1x128xf32>
    %216 = vector.extract_strided_slice %1 {offsets = [9, 0], sizes = [1, 128], strides = [1, 1]} : vector<16x128xf32> to vector<1x128xf32>
    %217 = arith.subf %216, %210 : vector<1x128xf32>
    %218 = vector.extract_strided_slice %1 {offsets = [10, 0], sizes = [1, 128], strides = [1, 1]} : vector<16x128xf32> to vector<1x128xf32>
    %219 = arith.subf %218, %215 : vector<1x128xf32>
    %220 = vector.extract_strided_slice %1 {offsets = [12, 0], sizes = [1, 128], strides = [1, 1]} : vector<16x128xf32> to vector<1x128xf32>
    %221 = arith.mulf %12, %220 : vector<1x128xf32>
    %222 = arith.mulf %221, %221 : vector<1x128xf32>
    %223 = arith.mulf %217, %217 : vector<1x128xf32>
    %cst_22 = arith.constant 1.000000e+04 : f32
    %224 = vector.broadcast %cst_22 : f32 to vector<1x128xf32>
    %225 = arith.mulf %224, %223 : vector<1x128xf32>
    %cst_23 = arith.constant 1.000000e+04 : f32
    %226 = vector.broadcast %cst_23 : f32 to vector<1x128xf32>
    %227 = arith.addf %223, %226 : vector<1x128xf32>
    %228 = tpu.reciprocal %227 {approx = true} : vector<1x128xf32> -> vector<1x128xf32>
    %229 = arith.mulf %227, %228 : vector<1x128xf32>
    %cst_24 = arith.constant 2.000000e+00 : f32
    %230 = vector.broadcast %cst_24 : f32 to vector<1x128xf32>
    %231 = arith.subf %230, %229 : vector<1x128xf32>
    %232 = arith.mulf %228, %231 : vector<1x128xf32>
    %233 = arith.mulf %225, %232 : vector<1x128xf32>
    %234 = arith.mulf %219, %219 : vector<1x128xf32>
    %cst_25 = arith.constant 1.000000e+04 : f32
    %235 = vector.broadcast %cst_25 : f32 to vector<1x128xf32>
    %236 = arith.mulf %235, %234 : vector<1x128xf32>
    %cst_26 = arith.constant 1.000000e+04 : f32
    %237 = vector.broadcast %cst_26 : f32 to vector<1x128xf32>
    %238 = arith.addf %234, %237 : vector<1x128xf32>
    %239 = tpu.reciprocal %238 {approx = true} : vector<1x128xf32> -> vector<1x128xf32>
    %240 = arith.mulf %238, %239 : vector<1x128xf32>
    %cst_27 = arith.constant 2.000000e+00 : f32
    %241 = vector.broadcast %cst_27 : f32 to vector<1x128xf32>
    %242 = arith.subf %241, %240 : vector<1x128xf32>
    %243 = arith.mulf %239, %242 : vector<1x128xf32>
    %244 = arith.mulf %236, %243 : vector<1x128xf32>
    %245 = arith.addf %233, %244 : vector<1x128xf32>
    %246 = arith.mulf %222, %245 : vector<1x128xf32>
    %247 = arith.addf %152, %246 : vector<1x128xf32>
    %248 = vector.shape_cast %247 : vector<1x128xf32> to vector<1x1x128xf32>
    %cst_28 = arith.constant dense<0.000000e+00> : vector<1xf32>
    %249 = vector.multi_reduction <add>, %248, %cst_28 [1, 2] : vector<1x1x128xf32> to vector<1xf32>
    %250 = vector.shape_cast %249 : vector<1xf32> to vector<1x1x1xf32>
    %251 = vector.extract %250[0, 0, 0] : f32 from vector<1x1x1xf32>
    %cst_29 = arith.constant 1.000000e+00 : f32
    %252 = arith.mulf %251, %cst_29 : f32
    %253 = arith.mulf %7, %13 : vector<1x128xf32>
    %254 = math.exp %253 : vector<1x128xf32>
    %255 = arith.mulf %5, %5 : vector<1x128xf32>
    %cst_30 = arith.constant 2.500000e-01 : f32
    %256 = vector.broadcast %cst_30 : f32 to vector<1x128xf32>
    %257 = arith.mulf %256, %255 : vector<1x128xf32>
    %258 = arith.mulf %6, %6 : vector<1x128xf32>
    %cst_31 = arith.constant 9.000000e-02 : f32
    %259 = vector.broadcast %cst_31 : f32 to vector<1x128xf32>
    %260 = arith.mulf %259, %258 : vector<1x128xf32>
    %261 = arith.addf %257, %260 : vector<1x128xf32>
    %262 = arith.mulf %14, %254 : vector<1x128xf32>
    %263 = arith.mulf %262, %254 : vector<1x128xf32>
    %cst_32 = arith.constant 2.000000e-01 : f32
    %264 = vector.broadcast %cst_32 : f32 to vector<1x128xf32>
    %265 = arith.mulf %264, %263 : vector<1x128xf32>
    %266 = arith.addf %261, %265 : vector<1x128xf32>
    %267 = vector.shape_cast %266 : vector<1x128xf32> to vector<1x1x128xf32>
    %cst_33 = arith.constant dense<0.000000e+00> : vector<1xf32>
    %268 = vector.multi_reduction <add>, %267, %cst_33 [1, 2] : vector<1x1x128xf32> to vector<1xf32>
    %269 = vector.shape_cast %268 : vector<1xf32> to vector<1x1x1xf32>
    %270 = vector.extract %269[0, 0, 0] : f32 from vector<1x1x1xf32>
    %271 = arith.addf %252, %270 : f32
    %c0_34 = arith.constant 0 : index
    %c0_35 = arith.constant 0 : index
    %272 = memref.load %arg3[%c0_34, %c0_35] : memref<1x1xf32, #tpu.memory_space<smem>>
    memref.store %271, %arg3[%c0_34, %c0_35] : memref<1x1xf32, #tpu.memory_space<smem>>
    return
  }
}

</mosaic_0001>

<bundles_post_ra>
// kernel: smplify_loss.1
= control target key start
LH: loop header
LB: loop body
LE: loop exit
PB: predicated region body
PF: predicated region fallthrough
CT: control target
= control target key end

     0   :  { %8 = vsyncpa [#allocation4], 0  ;;  %s585_s0 = inlined_call_operand.vmem [shape: f32[32], index: 0, kind: input, shape index: {}]   ;;  %s586_s1 = inlined_call_operand.vmem [shape: f32[8,128], index: 1, kind: input, shape index: {}]   ;;  %s587_s2 = inlined_call_operand.vmem [shape: f32[16,128], index: 2, kind: input, shape index: {}]   ;;  %s588_s3 = inlined_call_operand.hbm [shape: f32[1,1], index: 3, kind: output, shape index: {}]  }
   0x1   :  { %9 = vsyncpa [#allocation3], 0  ;;  %s15_s14 = sshll.u32 %s585_s0, 4  ;;  %s436_s15 = smov [#allocation2]   ;;  %s16_s14 = int_to_ptr.vmem [resolvable:$true] %s15_s14 }
   0x2   :  { %18 = dma.vmem_to_smem %s16_s14, 16, %s436_s15, [#allocation4]  }
   0x3   :  { %432 = dma.done.wait [#allocation4], 16  }
   0x4   :  { %433 = vsyncadd [#allocation4], 4294967280 }
   0x5   :  { %27 = sfence }
   0x6   :  { %s55_s16 = sld [smem:[#allocation2]]  ;;  %v468_v2 = vld [vmem:[%s586_s1] sm:$0xff]  ;;  %v31_v3 = vlaneseq  ;;  %vm292_vm1 = vcmask 1040384   ;;  %s344_s25 = sshll.u32 %s588_s3, 4  ;;  %s345_s25 = int_to_ptr.hbm [resolvable:$true] %s344_s25 }
   0x7   :  { %s355_s17 = sld [smem:[#allocation2 + $0x1]]  ;;  %v512_v34 = vld [vmem:[%s587_s2] sm:$0xff] }
   0x8   :  { %s356_s18 = sld [smem:[#allocation2 + $0x2]]  ;;  %v495_v23 = vand.u32 127, %v31_v3  ;;  %v35_v40 = vsub.f32 %v512_v34, %v468_v2 }
   0x9   :  { %s461_s19 = sld [smem:[#allocation2 + $0x3]] }
   0xa   :  { %s358_s20 = sld [smem:[#allocation2 + $0x4]]  ;;  %vm33_vm0 = vcmp.lt.s32.totalorder %v495_v23, 48  ;;  %v538_v57 = vmul.f32 %v35_v40, %v35_v40 }
   0xb   :  { %s463_s21 = sld [smem:[#allocation2 + $0x5]] }
   0xc   :  { %s360_s22 = sld [smem:[#allocation2 + $0x6]]  ;;  %v71_v6 = vstv %s55_s16 }
   0xd   :  { %s361_s23 = sld [smem:[#allocation2 + $0x7]]  ;;  %v73_v0 = vstv %s355_s17  ;;  %v72_v15 = vmul.f32 %v71_v6, %v468_v2 }
   0xe   :  { %s362_s24 = sld [smem:[#allocation2 + $0x8]]  ;;  %v74_v4 = vmul.f32 %v73_v0, %v468_v2  ;;  %v79_v7 = vstv %s356_s18 }
   0xf   :  { %s470_s26 = sld [smem:[#allocation2 + $0x9]]  ;;  %v87_v10 = vstv %s461_s19  ;;  %v80_v17 = vmul.f32 %v79_v7, %v468_v2 }
  0x10   :  { %v89_v1 = vstv %s358_s20  ;;  %s472_s27 = sld [smem:[#allocation2 + $0xb]]  ;;  %v76_v16 = vrot.slane %v74_v4, 1  ;;  %v88_v19 = vmul.f32 %v87_v10, %v468_v2 }
  0x11   :  { %s475_s28 = sld [smem:[#allocation2 + $0xa]]  ;;  %v90_v8 = vmul.f32 %v89_v1, %v468_v2  ;;  %v95_v11 = vstv %s463_s21  ;;  %v82_v27 = vrot.slane %v80_v17, 2 }
  0x12   :  { %v103_v5 = vstv %s360_s22  ;;  %s478_s29 = sld [smem:[#allocation2 + $0xc]]  ;;  %v96_v21 = vmul.f32 %v95_v11, %v468_v2  ;;  %v78_v26 = vadd.f32 %v76_v16, %v72_v15  ;;  %v38_v11 = vadd.f32 10000.0, %v538_v57 }
  0x13   :  { %v105_v9 = vstv %s361_s23  ;;  %v104_v12 = vmul.f32 %v103_v5, %v468_v2  ;;  %s484_s1 = sld [smem:[#allocation2 + $0xd]]  ;;  %v92_v20 = vrot.slane %v90_v8, 1 }
  0x14   :  { %v106_v13 = vmul.f32 %v105_v9, %v468_v2  ;;  %v111_v14 = vstv %s362_s24  ;;  %s488_s30 = sld [smem:[#allocation2 + $0x10]]  ;;  %v98_v30 = vrot.slane %v96_v21, 2  ;;  %v84_v33 = vadd.f32 %v82_v27, %v78_v26 }
  0x15   :  { %v112_v22 = vmul.f32 %v111_v14, %v468_v2  ;;  %s493_s4 = sld [smem:[#allocation2 + $0x11]]  ;;  %v94_v29 = vadd.f32 %v92_v20, %v88_v19  ;;  %v85_v35 = vstv %s470_s26 }
  0x16   :  { %v108_v18 = vrot.slane %v106_v13, 1  ;;  %s497_s5 = sld [smem:[#allocation2 + $0x12]]  ;;  %v117_v28 = vstv %s472_s27  ;;  %v86_v41 = vadd.f32 %v85_v35, %v84_v33 }
  0x17   :  { %v114_v25 = vrot.slane %v112_v22, 2  ;;  %s499_s6 = sld [smem:[#allocation2 + $0x13]]  ;;  %v100_v36 = vadd.f32 %v98_v30, %v94_v29  ;;  %v101_v38 = vstv %s475_s28 }
  0x18   :  { %v110_v24 = vadd.f32 %v108_v18, %v104_v12  ;;  %s502_s7 = sld [smem:[#allocation2 + $0x14]]  ;;  %v124_v42 = vstv %s478_s29  ;;  %s437_s29 = smov [#allocation5]  }
  0x19   :  { %s504_s8 = sld [smem:[#allocation2 + $0x15]]  ;;  %v102_v44 = vadd.f32 %v101_v38, %v100_v36  ;;  %v129_v45 = vstv %s484_s1  ;;  %v125_v58 = vmul.f32 %v124_v42, %v86_v41 }
  0x1a   :  { %v116_v31 = vadd.f32 %v114_v25, %v110_v24  ;;  %s376_s9 = sld [smem:[#allocation2 + $0x16]]  ;;  %v188_v48 = vstv %s488_s30  ;;  %v559_v24 = vld [vmem:[%s587_s2 + $0x8] sm:$0xff] }
  0x1b   :  { %s377_s10 = sld [smem:[#allocation2 + $0x17]]  ;;  %v190_v39 = vstv %s493_s4  ;;  %v130_v62 = vmul.f32 %v129_v45, %v102_v44  ;;  %v189_v63 = vmul.f32 %v188_v48, %v468_v2 }
  0x1c   :  { %v118_v32 = vadd.f32 %v117_v28, %v116_v31  ;;  %s507_s11 = sld [smem:[#allocation2 + $0x18]]  ;;  %v191_v49 = vmul.f32 %v190_v39, %v468_v2  ;;  %v196_v50 = vstv %s497_s5 }
  0x1d   :  { %s522_s14 = sld [smem:[#allocation2 + $0x1b]]  ;;  %v204_v59 = vstv %s499_s6  ;;  %v197_v3 = vmul.f32 %v196_v50, %v468_v2 }
  0x1e   :  { %v119_v37 = vsel %vm33_vm0, %v118_v32, 1.0  ;;  %v206_v43 = vstv %s502_s7  ;;  %s525_s15 = sld [smem:[#allocation2 + $0xe]]  ;;  %v193_v1 = vrot.slane %v191_v49, 1  ;;  %v205_v7 = vmul.f32 %v204_v59, %v468_v2 }
  0x1f   :  { %392 = vrcp.f32 %v119_v37  ;;  %s528_s16 = sld [smem:[#allocation2 + $0xf]]  ;;  %v212_v51 = vstv %s504_s8  ;;  %v207_v52 = vmul.f32 %v206_v43, %v468_v2  ;;  %v199_v17 = vrot.slane %v197_v3, 2 }
  0x20   :  { %v220_v46 = vstv %s376_s9  ;;  %v213_v4 = vmul.f32 %v212_v51, %v468_v2  ;;  %s545_s17 = sld [smem:[#allocation2 + $0x19]]  ;;  %v195_v16 = vadd.f32 %v193_v1, %v189_v63  ;;  %394 = vrcp.f32 %v38_v11 }
  0x21   :  { %v222_v47 = vstv %s377_s10  ;;  %v221_v53 = vmul.f32 %v220_v46, %v468_v2  ;;  %v209_v8 = vrot.slane %v207_v52, 1  ;;  %s548_s18 = sld [smem:[#allocation2 + $0x1a]] }
  0x22   :  { %v223_v54 = vmul.f32 %v222_v47, %v468_v2  ;;  %v228_v55 = vstv %s507_s11  ;;  %v215_v18 = vrot.slane %v213_v4, 2  ;;  %s554_s19 = sld [smem:[#allocation2 + $0x1c]]  ;;  %v201_v30 = vadd.f32 %v199_v17, %v195_v16 }
  0x23   :  { %v229_v60 = vmul.f32 %v228_v55, %v468_v2  ;;  %v234_v10 = vstv %s522_s14  ;;  %v211_v21 = vadd.f32 %v209_v8, %v205_v7  ;;  %s383_s22 = sld [smem:[#allocation2 + $0x1d]]  ;;  %v37_v4 = vmul.f32 10000.0, %v538_v57 }
  0x24   :  { %v225_v0 = vrot.slane %v223_v54, 1  ;;  %v127_v13 = vstv %s525_s15  ;;  %s384_s2 = sld [smem:[#allocation2 + $0x1e]] }
  0x25   :  { %v393_v56 = vpop.eup %392  ;;  %v231_v5 = vrot.slane %v229_v60, 2  ;;  %v132_v15 = vstv %s528_s16  ;;  %v217_v31 = vadd.f32 %v215_v18, %v211_v21  ;;  %s385_s23 = sld [smem:[#allocation2 + $0x1f]] }
  0x26   :  { %v121_v61 = vmul.f32 %v393_v56, %v119_v37  ;;  %v227_v9 = vadd.f32 %v225_v0, %v221_v53  ;;  %v202_v32 = vstv %s545_s17  ;;  %v395_v37 = vpop.eup %394  ;;  %v303_v0 = vmul.f32 %v512_v34, %v468_v2 }
  0x27   :  { %v218_v33 = vstv %s548_s18  ;;  %v203_v40 = vadd.f32 %v202_v32, %v201_v30  ;;  %v40_v49 = vmul.f32 %v395_v37, %v38_v11 }
  0x28   :  { %v122_v6 = vsub.f32 2.0, %v121_v61  ;;  %v233_v14 = vadd.f32 %v231_v5, %v227_v9  ;;  %v219_v23 = vadd.f32 %v218_v33, %v217_v31  ;;  %v241_v42 = vstv %s554_s19 }
  0x29   :  { %v246_v43 = vstv %s383_s22  ;;  %v242_v47 = vmul.f32 %v241_v42, %v203_v40  ;;  %v304_v11 = vmul.f32 1.442695, %v303_v0 }
  0x2a   :  { %v123_v12 = vmul.f32 %v393_v56, %v122_v6  ;;  %v235_v22 = vadd.f32 %v234_v10, %v233_v14  ;;  %v247_v48 = vmul.f32 %v246_v43, %v219_v23  ;;  %v244_v51 = vstv %s384_s2 }
  0x2b   :  { %v249_v52 = vstv %s385_s23  ;;  %v41_v56 = vsub.f32 2.0, %v40_v49  ;;  %v259_v49 = vmul.f32 %v559_v24, %v512_v34 }
  0x2c   :  { %v126_v19 = vmul.f32 %v125_v58, %v123_v12  ;;  %v131_v20 = vmul.f32 %v130_v62, %v123_v12  ;;  %v236_v27 = vsel %vm33_vm0, %v235_v22, 1.0 }
  0x2d   :  { %396 = vrcp.f32 %v236_v27  ;;  %v42_v5 = vmul.f32 %v395_v37, %v41_v56 }
  0x2e   :  { %v128_v25 = vadd.f32 %v127_v13, %v126_v19  ;;  %v133_v26 = vadd.f32 %v132_v15, %v131_v20  ;;  %v140_v20 = vrot.slane %v559_v24, 7 }
  0x2f   :  { %v43_v14 = vmul.f32 %v42_v5, %v37_v4 }
  0x30   :  { %v135_v28 = vrot.slane %v128_v25, 1  ;;  %v138_v29 = vsub.f32 %v559_v24, %v133_v26 }
  0x31   :  { %v45_v57 = vrot.slane %v43_v14, 1 }
  0x32   :  { %v137_v35 = vsub.f32 %v512_v34, %v135_v28  ;;  %v152_v36 = vmul.f32 %v138_v29, %v138_v29  ;;  %v142_v28 = vmul.f32 %v140_v20, %v512_v34 }
  0x33   :  { %v397_v41 = vpop.eup %396  ;;  %v47_v26 = vadd.f32 %v45_v57, %v43_v14 }
  0x34   :  { %v144_v38 = vmul.f32 %v137_v35, %v137_v35  ;;  %v154_v39 = vadd.f32 10000.0, %v152_v36  ;;  %v238_v45 = vmul.f32 %v397_v41, %v236_v27  ;;  %v153_v6 = vmul.f32 10000.0, %v152_v36 }
  0x35   :  { %v48_v27 = vrot.slane %v43_v14, 2  ;;  %v143_v37 = vmul.f32 %v142_v28, %v142_v28 }
  0x36   :  { %v146_v44 = vadd.f32 10000.0, %v144_v38  ;;  %398 = vrcp.f32 %v154_v39  ;;  %v239_v46 = vsub.f32 2.0, %v238_v45  ;;  %v145_v15 = vmul.f32 10000.0, %v144_v38 }
  0x37   :  { %v50_v36 = vadd.f32 %v48_v27, %v47_v26 }
  0x38   :  { %400 = vrcp.f32 %v146_v44  ;;  %v240_v50 = vmul.f32 %v397_v41, %v239_v46  ;;  %v34_v46 = vmul.f32 %v512_v34, %v512_v34 }
  0x39   :  { %402 = vpow2.f32 %v304_v11 }
  0x3a   :  { %v243_v54 = vmul.f32 %v242_v47, %v240_v50  ;;  %v248_v55 = vmul.f32 %v247_v48, %v240_v50  ;;  %v52_v47 = vrot.slane %v50_v36, 5 }
  0x3c   :  { %v399_v53 = vpop.eup %398  ;;  %v245_v60 = vadd.f32 %v244_v51, %v243_v54  ;;  %v250_v61 = vadd.f32 %v249_v52, %v248_v55  ;;  %v54_v55 = vmul.f32 %v52_v47, %v34_v46 }
  0x3d   :  { %v156_v58 = vmul.f32 %v399_v53, %v154_v39 }
  0x3e   :  { %v401_v59 = vpop.eup %400  ;;  %v252_v1 = vrot.slane %v245_v60, 7  ;;  %v256_v3 = vrot.slane %v250_v61, 6 }
  0x3f   :  { %v148_v62 = vmul.f32 %v401_v59, %v146_v44  ;;  %v157_v63 = vsub.f32 2.0, %v156_v58  ;;  %v403_v25 = vpop.eup %402  ;;  %v306_v44 = vmul.f32 %v468_v2, %v468_v2  ;;  %v260_v58 = vmul.f32 %v259_v49, %v259_v49 }
  0x40   :  { %v254_v9 = vsub.f32 %v559_v24, %v252_v1  ;;  %v258_v10 = vsub.f32 %v559_v24, %v256_v3  ;;  %v314_v35 = vrot.slane %v403_v25, 7 }
  0x41   :  { %v149_v7 = vsub.f32 2.0, %v148_v62  ;;  %v158_v8 = vmul.f32 %v399_v53, %v157_v63  ;;  %v308_v53 = vmul.f32 0.09, %v306_v44  ;;  %v307_v60 = vmul.f32 0.25, %v306_v44 }
  0x42   :  { %v261_v12 = vmul.f32 %v254_v9, %v254_v9  ;;  %v269_v13 = vmul.f32 %v258_v10, %v258_v10  ;;  %v316_v45 = vmul.f32 %v314_v35, %v512_v34 }
  0x43   :  { %v150_v16 = vmul.f32 %v401_v59, %v149_v7  ;;  %v159_v17 = vmul.f32 %v158_v8, %v153_v6  ;;  %v310_v61 = vrot.slane %v308_v53, 1 }
  0x44   :  { %v263_v18 = vadd.f32 10000.0, %v261_v12  ;;  %v271_v19 = vadd.f32 10000.0, %v269_v13  ;;  %v262_v40 = vmul.f32 10000.0, %v261_v12  ;;  %v270_v23 = vmul.f32 10000.0, %v269_v13 }
  0x45   :  { %v151_v21 = vmul.f32 %v150_v16, %v145_v15  ;;  %v161_v22 = vrot.slane %v159_v17, 1  ;;  %v317_v54 = vmul.f32 %v316_v45, %v314_v35  ;;  %v312_v3 = vadd.f32 %v310_v61, %v307_v60 }
  0x46   :  { %404 = vrcp.f32 %v263_v18 }
  0x47   :  { %406 = vrcp.f32 %v271_v19  ;;  %v163_v30 = vadd.f32 %v161_v22, %v151_v21  ;;  %v318_v62 = vmul.f32 0.2, %v317_v54 }
  0x49   :  { %v165_v39 = vrot.slane %v163_v30, 3  ;;  %v320_v4 = vrot.slane %v318_v62, 3 }
  0x4b   :  { %v167_v48 = vmul.f32 %v165_v39, %v143_v37  ;;  %v322_v24 = vadd.f32 %v320_v4, %v312_v3 }
  0x4c   :  { %v405_v29 = vpop.eup %404 }
  0x4d   :  { %v407_v31 = vpop.eup %406  ;;  %v265_v32 = vmul.f32 %v405_v29, %v263_v18  ;;  %v169_v56 = vrot.slane %v167_v48, 1  ;;  %v324_v7 = vrot.slane %v322_v24, 3 }
  0x4e   :  { %v273_v33 = vmul.f32 %v407_v31, %v271_v19 }
  0x4f   :  { %v266_v38 = vsub.f32 2.0, %v265_v32  ;;  %v171_v63 = vadd.f32 %v169_v56, %v54_v55  ;;  %v326_v8 = vsel %vm292_vm1, %v324_v7, 0.0 }
  0x50   :  { %v274_v41 = vsub.f32 2.0, %v273_v33 }
  0x51   :  { %v267_v42 = vmul.f32 %v405_v29, %v266_v38 }
  0x52   :  { %v275_v43 = vmul.f32 %v407_v31, %v274_v41 }
  0x53   :  { %v268_v50 = vmul.f32 %v267_v42, %v262_v40 }
  0x54   :  { %v276_v51 = vmul.f32 %v275_v43, %v270_v23 }
  0x56   :  { %v278_v52 = vrot.slane %v276_v51, 1 }
  0x58   :  { %v280_v59 = vadd.f32 %v278_v52, %v268_v50 }
  0x5a   :  { %v282_v2 = vrot.slane %v280_v59, 5 }
  0x5c   :  { %v284_v0 = vmul.f32 %v282_v2, %v260_v58 }
  0x5e   :  { %v286_v1 = vrot.slane %v284_v0, 1 }
  0x60   :  { %v288_v5 = vadd.f32 %v286_v1, %v171_v63 }
  0x62   :  { %v290_v34 = vrot.slane %v288_v5, 3 }
  0x64   :  { %v293_v6 = vsel %vm292_vm1, %v290_v34, 0.0 }
  0x65   :  { %294 = vadd.xlane.f32.xlu0 %v293_v6 }
  0x6d   :  { %327 = vadd.xlane.f32.xlu0 %v326_v8 }
  0xd8   :  { %v295_v9 = vpop.xlane.xlu0 %294 }
  0xd9   :  { %v296_v10 = vrot.slane %v295_v9, 4 }
  0xdb   :  { %v297_v11 = vadd.f32 %v296_v10, %v295_v9 }
  0xdd   :  { %v298_v12 = vrot.slane %v297_v11, 2 }
  0xdf   :  { %v299_v13 = vadd.f32 %v298_v12, %v297_v11 }
  0xe0   :  { %v328_v14 = vpop.xlane.xlu0 %327 }
  0xe1   :  { %v329_v15 = vrot.slane %v328_v14, 4  ;;  %v300_v16 = vrot.slane %v299_v13, 1 }
  0xe3   :  { %v330_v17 = vadd.f32 %v329_v15, %v328_v14  ;;  %v301_v18 = vadd.f32 %v300_v16, %v299_v13 }
  0xe5   :  { %v331_v19 = vrot.slane %v330_v17, 2  ;;  %386 = vpush %v301_v18 }
  0xe7   :  { %v332_v57 = vadd.f32 %v331_v19, %v330_v17 }
  0xe9   :  { %v333_v20 = vrot.slane %v332_v57, 1 }
  0xeb   :  { %v334_v21 = vadd.f32 %v333_v20, %v332_v57 }
  0xed   :  { %388 = vpush %v334_v21 }
 0x116   :  { %s387_s26 = spop %386 }
 0x11e   :  { %s389_s27 = spop %388 }
 0x11f   :  { %s336_s28 = sadd.f32 %s389_s27, %s387_s26 }
 0x121   :  { %338 = sst [smem:[#allocation5]] %s336_s28 }
 0x122   :  { %347 = dma.smem_to_hbm %s437_s29, 16, %s345_s25, [#allocation3]  }
 0x123   :  { %434 = dma.done.wait [#allocation3], 16  }
 0x124   :  { %435 = vsyncadd [#allocation3], 4294967280 }
 0x125   :  { %352 = sfence }
 0x126   :  { %353 = vsyncpa [#allocation3], 1 }
 0x127   :  { %354 = vsyncpa [#allocation4], 1 }

</bundles_post_ra>
